<compile_context>
chip_gen: v7x
topology: tpu7x:2x2x1
jax: 0.10.0
libtpu: 0.0.40
codegen_flags: <defaults>
</compile_context>

<pallas_src>
import functools
import math

import numpy as np
import jax
import jax.numpy as jnp
from jax import lax
from jax.experimental import pallas as pl
from jax.experimental.pallas import tpu as pltpu


def _pos_enc_kernel(x_ref, freq_ref, phase_ref, o_ref, *, d, n_bands):
    # x_ref:     (rt, d)      input rows for this tile
    # freq_ref:  (1, out_d)   per-output-column frequency (1, 2, 2, 4, 4, ...)
    # phase_ref: (1, out_d)   0 for identity/sin columns, pi/2 for cos columns
    # o_ref:     (rt, out_d)  encoded output tile (PyTorch row-major layout)
    x = x_ref[...].astype(jnp.float32)                     # single load, f32 phase math
    # Lane-broadcast: column j of xb is x[:, j % d]  (bands are concatenated).
    xb = jnp.concatenate([x] * n_bands, axis=-1)           # (rt, out_d)
    # One transcendental pass over the whole tile: cos(t) = sin(t + pi/2).
    enc = jnp.sin(xb * freq_ref[...] + phase_ref[...])     # (rt, out_d)
    # Identity band (columns [0, d)) passes the input through untouched.
    col = lax.broadcasted_iota(jnp.int32, enc.shape, 1)
    out = jnp.where(col < d, xb, enc)
    o_ref[...] = out.astype(o_ref.dtype)                   # one contiguous full-tile store


def _round_up(a, b):
    return ((a + b - 1) // b) * b


def positional_encoding(angles, num_encoding_functions=6, row_tile=2048):
    """Pallas TPU positional encoding.

    angles: jnp array of shape (..., D), float dtype.
    returns: (..., D * (1 + 2 * num_encoding_functions)), same dtype.
    """
    orig_shape = angles.shape
    d = orig_shape[-1]
    rows = math.prod(orig_shape[:-1]) if len(orig_shape) > 1 else 1
    n_bands = 1 + 2 * num_encoding_functions
    out_d = d * n_bands

    # Free row-major reshape — no transpose, no pad, no extra HBM pass.
    x2d = angles.reshape(rows, d)

    # Lane-constant frequency / phase tables (tiny, DMA'd once per grid step).
    freqs = np.ones((out_d,), np.float32)
    phases = np.zeros((out_d,), np.float32)
    for i in range(1, num_encoding_functions + 1):
        freqs[(2 * i - 1) * d:(2 * i + 1) * d] = 2.0 ** i          # sin & cos bands of 2^i
        phases[(2 * i) * d:(2 * i + 1) * d] = np.pi / 2.0          # cos t = sin(t + pi/2)
    freq = jnp.asarray(freqs.reshape(1, out_d))
    phase = jnp.asarray(phases.reshape(1, out_d))

    # Row-tile selection: multiple of 8 (sublane rule; last dims are full-extent),
    # VMEM-capped (~6 MiB incl. double-buffering + f32 temporaries, safe on v5e's
    # 16 MiB default scoped VMEM), and capped so the grid has >= ~8 steps.
    if rows < 8:
        rt = rows                                   # full-extent block (tiny inputs)
    else:
        bytes_per_row = 4 * 128 * (2 + 2 + 4)       # lane-padded in/out (dbl-buf) + temps
        rt_cap = max(8, ((6 * 1024 * 1024) // bytes_per_row) // 8 * 8)
        rt = min(row_tile, rt_cap)
        rt = min(rt, _round_up(pl.cdiv(rows, 8), 8))  # >= ~8 grid steps when possible
        rt = max(8, (rt // 8) * 8)

    grid = (pl.cdiv(rows, rt),)   # uneven last block handled by Pallas (OOB rows masked)

    kernel = functools.partial(_pos_enc_kernel, d=d, n_bands=n_bands)

    itemsize = jnp.dtype(angles.dtype).itemsize
    cost = pl.CostEstimate(
        flops=3 * rows * out_d,
        transcendentals=rows * out_d,
        bytes_accessed=rows * d * itemsize + rows * out_d * itemsize,
    )

    out2d = pl.pallas_call(
        kernel,
        out_shape=jax.ShapeDtypeStruct((rows, out_d), angles.dtype),
        grid_spec=pltpu.PrefetchScalarGridSpec(
            num_scalar_prefetch=0,
            grid=grid,
            in_specs=[
                pl.BlockSpec((rt, d), lambda i: (i, 0)),
                pl.BlockSpec((1, out_d), lambda i: (0, 0)),
                pl.BlockSpec((1, out_d), lambda i: (0, 0)),
            ],
            out_specs=pl.BlockSpec((rt, out_d), lambda i: (i, 0)),
        ),
        compiler_params=pltpu.CompilerParams(
            dimension_semantics=("parallel",),
        ),
        cost_estimate=cost,
    )(x2d, freq, phase)

    return out2d.reshape(*orig_shape[:-1], out_d)


def _reference(angles, num_encoding_functions=6):
    pieces = [angles]
    for i in range(1, num_encoding_functions + 1):
        pieces.append(jnp.sin((2.0 ** i) * angles))
        pieces.append(jnp.cos((2.0 ** i) * angles))
    return jnp.concatenate(pieces, axis=-1)


if __name__ == "__main__":
    key = jax.random.PRNGKey(0)

    # Small shapes: batch=2, seq=8, 3 angles per position (e.g. Euler angles).
    angles = jax.random.uniform(
        key, (2, 8, 3), dtype=jnp.float32, minval=-3.14159, maxval=3.14159
    )
    out = jax.block_until_ready(positional_encoding(angles, num_encoding_functions=6))
    ref = _reference(angles, num_encoding_functions=6)
    assert out.shape == (2, 8, 3 * (1 + 2 * 6)), out.shape
    # Tolerance: cos is computed as sin(t + pi/2); the f32 rounding of the phase
    # add at |t| ~ 2^6*pi contributes up to ~1e-5 absolute vs. a direct cos.
    err = float(jnp.max(jnp.abs(out - ref)))
    assert err < 3e-5, err

    # Second check: multi-block grid + uneven (partial) last block (rows = 520).
    key2 = jax.random.PRNGKey(1)
    angles2 = jax.random.uniform(
        key2, (4, 130, 3), dtype=jnp.float32, minval=-3.14159, maxval=3.14159
    )
    out2 = jax.block_until_ready(
        positional_encoding(angles2, num_encoding_functions=6, row_tile=128)
    )
    ref2 = _reference(angles2, num_encoding_functions=6)
    assert out2.shape == (4, 130, 39), out2.shape
    err2 = float(jnp.max(jnp.abs(out2 - ref2)))
    assert err2 < 3e-5, err2

    print("KERNEL_OK")
</pallas_src>

<mosaic_0001>
module attributes {stable_mosaic.version = 11 : i64} {
  func.func @_pos_enc_kernel(%arg0: i32, %arg1: memref<8x3xf32, #tpu.memory_space<vmem>>, %arg2: memref<1x39xf32, #tpu.memory_space<vmem>>, %arg3: memref<1x39xf32, #tpu.memory_space<vmem>>, %arg4: memref<8x39xf32, #tpu.memory_space<vmem>>) attributes {dimension_semantics = [#tpu.dimension_semantics<parallel>], iteration_bounds = array<i64: 2>, scalar_prefetch = 0 : i64, scratch_operands = 0 : i64, tpu.core_type = #tpu.core_type<tc>, window_params = [{transform_indices = @transform_0, window_bounds = array<i64: 8, 3>}, {pipeline_mode = #tpu.pipeline_mode<synchronous>, transform_indices = @transform_1, window_bounds = array<i64: 1, 39>}, {pipeline_mode = #tpu.pipeline_mode<synchronous>, transform_indices = @transform_2, window_bounds = array<i64: 1, 39>}, {transform_indices = @transform_3, window_bounds = array<i64: 8, 39>}]} {
    %c0 = arith.constant 0 : index
    %c0_0 = arith.constant 0 : index
    %0 = vector.load %arg1[%c0, %c0_0] : memref<8x3xf32, #tpu.memory_space<vmem>>, vector<8x3xf32>
    %1 = tpu.concatenate %0, %0, %0, %0, %0, %0, %0, %0, %0, %0, %0, %0, %0 in 1 : vector<8x3xf32>, vector<8x3xf32>, vector<8x3xf32>, vector<8x3xf32>, vector<8x3xf32>, vector<8x3xf32>, vector<8x3xf32>, vector<8x3xf32>, vector<8x3xf32>, vector<8x3xf32>, vector<8x3xf32>, vector<8x3xf32>, vector<8x3xf32> -> vector<8x39xf32>
    %c0_1 = arith.constant 0 : index
    %c0_2 = arith.constant 0 : index
    %2 = vector.load %arg2[%c0_1, %c0_2] : memref<1x39xf32, #tpu.memory_space<vmem>>, vector<1x39xf32>
    %3 = vector.broadcast %2 : vector<1x39xf32> to vector<8x39xf32>
    %4 = arith.mulf %1, %3 : vector<8x39xf32>
    %c0_3 = arith.constant 0 : index
    %c0_4 = arith.constant 0 : index
    %5 = vector.load %arg3[%c0_3, %c0_4] : memref<1x39xf32, #tpu.memory_space<vmem>>, vector<1x39xf32>
    %6 = vector.broadcast %5 : vector<1x39xf32> to vector<8x39xf32>
    %7 = arith.addf %4, %6 : vector<8x39xf32>
    %8 = math.sin %7 : vector<8x39xf32>
    %9 = tpu.iota {dimensions = array<i32: 1>} : vector<8x39xi32>
    %c3_i32 = arith.constant 3 : i32
    %10 = vector.broadcast %c3_i32 : i32 to vector<8x39xi32>
    %11 = arith.cmpi slt, %9, %10 : vector<8x39xi32>
    %12 = arith.select %11, %1, %8 : vector<8x39xi1>, vector<8x39xf32>
    %c0_5 = arith.constant 0 : index
    %c0_6 = arith.constant 0 : index
    %13 = vector.load %arg4[%c0_5, %c0_6] : memref<8x39xf32, #tpu.memory_space<vmem>>, vector<8x39xf32>
    tpu.vector_store %arg4[%c0_5, %c0_6], %12 {strides = array<i32>} : memref<8x39xf32, #tpu.memory_space<vmem>>, vector<8x39xf32>,
    return
  }
  func.func @transform_0(%arg0: i32) -> (i32, i32) {
    %c0_i32 = arith.constant 0 : i32
    %c0_i32_0 = arith.constant 0 : i32
    return %arg0, %c0_i32 : i32, i32
  }
  func.func @transform_1(%arg0: i32) -> (i32, i32) {
    %c0_i32 = arith.constant 0 : i32
    %c0_i32_0 = arith.constant 0 : i32
    %c0_i32_1 = arith.constant 0 : i32
    return %c0_i32, %c0_i32_0 : i32, i32
  }
  func.func @transform_2(%arg0: i32) -> (i32, i32) {
    %c0_i32 = arith.constant 0 : i32
    %c0_i32_0 = arith.constant 0 : i32
    %c0_i32_1 = arith.constant 0 : i32
    return %c0_i32, %c0_i32_0 : i32, i32
  }
  func.func @transform_3(%arg0: i32) -> (i32, i32) {
    %c0_i32 = arith.constant 0 : i32
    %c0_i32_0 = arith.constant 0 : i32
    return %arg0, %c0_i32 : i32, i32
  }
}

</mosaic_0001>

<bundles_post_ra>
// kernel: tpu_custom_call.1
= control target key start
LH: loop header
LB: loop body
LE: loop exit
PB: predicated region body
PF: predicated region fallthrough
CT: control target
= control target key end

     0   :  { %8 = vsyncpa [#allocation3], 0  ;;  %s742_s0 = inlined_call_operand.vmem [shape: f32[16,3], index: 0, kind: input, shape index: {}]   ;;  %s743_s1 = inlined_call_operand.vmem [shape: f32[1,39], index: 1, kind: input, shape index: {}]   ;;  %s744_s2 = inlined_call_operand.vmem [shape: f32[1,39], index: 2, kind: input, shape index: {}]   ;;  %s745_s3 = inlined_call_operand.hbm [shape: f32[16,39], index: 3, kind: output, shape index: {}]  }
   0x1   :  { %10 = vsyncpa [#allocation3 + $0x1], 0  ;;  %s611_s12 = smov 0   ;;  %s613_s13 = smov 0  }
   0x2   :  { %s615_s14 = smov 0   ;;  %s617_s15 = smov 0  }
   0x3 LB: > { %s632_s16 = sadd.s32 4294967295, %s570_s15   ;;  %s427_s17 = sadd.s32 4294967294, %s570_s15   ;;  %s570_s15 = sphi %s617_s15, %s751_s15   ;;  %s566_s14 = sphi %s615_s14, %s750_s14   ;;  %s562_s13 = sphi %s613_s13, %s749_s13   ;;  %s558_s12 = sphi %s611_s12, %s748_s12  }
   0x4   : > { %s636_s18 = sadd.s32 1, %s570_s15   ;;  %s91_s19 = sadd.s32 1, %s566_s14 }
   0x5   : > { %s88_s20 = ssub.s32 %s570_s15, %s636_s18  ;;  %p101_p0 = scmp.ne.s32.totalorder %s566_s14, %s562_s13 }
   0x6   : > { %p89_p1 = scmp.eq.s32.totalorder %s88_s20, 0  ;;  %p102_p2 = scmp.eq.s32.totalorder %s632_s16, 1 }
   0x7   : > { %p107_p3 = scmp.ne.s32.totalorder %s562_s13, %s558_s12  ;;  %p108_p4 = scmp.eq.s32.totalorder %s427_s17, 1 }
   0x8   : > { %s647_s21 = scalar_select %p89_p1, %s566_s14, %s91_s19  }
   0x9   : > { %p649_p5 = por %p102_p2, %p101_p0  ;;  %p653_p6 = por %p108_p4, %p107_p3 }
   0xa   : > { %p430_p7 = scmp.ge.s32.totalorder %s570_s15, 1  ;;  %p139_p8 = scmp.lt.s32.totalorder %s570_s15, 3 }
   0xc   : > { %p140_p9 = pnand %p430_p7, %p139_p8 }
   0xd   : > { %p162_p10 = scmp.lt.s32.totalorder (!%p140_p9), %s632_s16, 1  ;;  %s572_s29 = smov (!%p140_p9), 3   ;;  %vm204_vm0 = vcmask (!%p140_p9), 23552   ;;  %vm206_vm1 = vcmask (!%p140_p9), 48128   ;;  %vm208_vm2 = vcmask (!%p140_p9), 72704   ;;  %vm210_vm3 = vcmask (!%p140_p9), 97280  }
   0xe   : > { %143 = sbr.rel (%p140_p9) target bundleno = 261 (0x105), region = 32  ;;  %s573_s30 = smov (!%p140_p9), 9   ;;  %vm212_vm4 = vcmask (!%p140_p9), 121856   ;;  %vm214_vm5 = vcmask (!%p140_p9), 146432   ;;  %vm216_vm6 = vcmask (!%p140_p9), 171008   ;;  %vm218_vm7 = vcmask (!%p140_p9), 195584  }
   0xf   : > { %s574_s4 = smov (!%p140_p9), 6   ;;  %s575_s5 = smov (!%p140_p9), 12   ;;  %vm220_vm8 = vcmask (!%p140_p9), 220160   ;;  %vm222_vm9 = vcmask (!%p140_p9), 244736   ;;  %vm224_vm10 = vcmask (!%p140_p9), 269312   ;;  %vm226_vm11 = vcmask (!%p140_p9), 293888  }
  0x10   : > { %s576_s6 = smov (!%p140_p9), 15   ;;  %s577_s7 = smov (!%p140_p9), 18   ;;  %v433_v22 = vld [vmem:[%s743_s1] ss:$0 sm:$0xff] (!%p140_p9)  ;;  %v584_v39 = vmov (!%p140_p9), 683565275  }
  0x11   : > { %s578_s8 = smov (!%p140_p9), 21   ;;  %s579_s9 = smov (!%p140_p9), 24   ;;  %v434_v25 = vld [vmem:[%s744_s2] ss:$0 sm:$0xff] (!%p140_p9)  ;;  %v585_v41 = vmov (!%p140_p9), 2475754826  }
  0x12   : > { %s580_s10 = smov (!%p140_p9), 27   ;;  %s581_s11 = smov (!%p140_p9), 30   ;;  %v586_v44 = vmov (!%p140_p9), 2131351028   ;;  %v587_v47 = vmov (!%p140_p9), 2102212464  }
  0x13   : > { %s582_s17 = smov (!%p140_p9), 33   ;;  %s583_s19 = smov (!%p140_p9), 36   ;;  %v588_v50 = vmov (!%p140_p9), 920167782   ;;  %v589_v53 = vmov (!%p140_p9), 1326507024  }
  0x14   : > { %s159_s27 = sand.u32 (!%p140_p9), 1, %s562_s13  }
  0x15   : > { %s163_s24 = scalar_select %p162_p10, %s632_s16, 1 }
  0x17   : > { %s432_s25 = sshll.u32 %s163_s24, 3 }
  0x18   : > { %s165_s28 = scalar_lea.vmem %s742_s0, %s432_s25 }
  0x19   : > { %v166_v0 = vld [vmem:[%s165_s28] sm:$0xff]  ;;  %s431_s28 = sshll.u32 %s159_s27, 3 }
  0x1a   : > { %168 = vrot.lane.b32.xlu0 %v166_v0, %s572_s29  ;;  %174 = vrot.lane.b32.xlu1 %v166_v0, %s573_s30  ;;  %s440_s29 = sshll.u32 %s632_s16, 7  ;;  %s161_s30 = scalar_lea.vmem [#allocation2], %s431_s28 }
  0x1b   : > { %s355_s16 = scalar_lea.sflag [#allocation3], %s159_s27 }
  0x1e   : > { %171 = vrot.lane.b32.xlu0 %v166_v0, %s574_s4  ;;  %177 = vrot.lane.b32.xlu1 %v166_v0, %s575_s5  ;;  %s368_s4 = sshll.u32 %s161_s30, 4  ;;  %s701_s4 = int_to_ptr.vmem [resolvable:$true] %s368_s4 }
  0x22   : > { %180 = vrot.lane.b32.xlu0 %v166_v0, %s576_s6  ;;  %183 = vrot.lane.b32.xlu1 %v166_v0, %s577_s7  ;;  %s699_s7 = scalar_lea.hbm %s745_s3, %s440_s29 }
  0x26   : > { %186 = vrot.lane.b32.xlu0 %v166_v0, %s578_s8  ;;  %189 = vrot.lane.b32.xlu1 %v166_v0, %s579_s9  ;;  %s508_s8 = scalar_lea.vmem %s701_s4, 128  ;;  %s590_s9 = smov [#allocation2]  }
  0x27   : > { %p509_p11 = scmp.ne.s32.totalorder %s701_s4, %s508_s8 }
  0x29   : > { %p510_p12 = pnand %p509_p11, %p649_p5 }
  0x2a   : > { %192 = vrot.lane.b32.xlu0 %v166_v0, %s580_s10  ;;  %195 = vrot.lane.b32.xlu1 %v166_v0, %s581_s11  ;;  %s512_s10 = sshll.u32 %s590_s9, 4  ;;  %s513_s10 = int_to_ptr.vmem [resolvable:$false] %s512_s10 }
  0x2b   : > { %p511_p13 = pneg %p510_p12  ;;  %s514_s11 = scalar_lea.vmem %s513_s10, 256 }
  0x2c   : > { %p515_p0 = scmp.lt.s32.totalorder %s701_s4, %s513_s10  ;;  %p516_p1 = scmp.lt.s32.totalorder %s514_s11, %s508_s8 }
  0x2e   : > { %198 = vrot.lane.b32.xlu0 %v166_v0, %s582_s17  ;;  %201 = vrot.lane.b32.xlu1 %v166_v0, %s583_s19  ;;  %p517_p2 = por %p516_p1, %p515_p0 }
  0x30   : > { %p518_p3 = pnand %p517_p2, %p511_p13 }
  0x8c   : > { %v169_v1 = vpop.permute.xlu0 %168  ;;  %v175_v2 = vpop.permute.xlu1 %174 }
  0x8d   : > { %v205_v3 = vsel %vm204_vm0, %v166_v0, %v169_v1 }
  0x90   : > { %v172_v4 = vpop.permute.xlu0 %171  ;;  %v178_v5 = vpop.permute.xlu1 %177 }
  0x91   : > { %v207_v6 = vsel %vm206_vm1, %v205_v3, %v172_v4 }
  0x92   : > { %v209_v7 = vsel %vm208_vm2, %v207_v6, %v175_v2 }
  0x93   : > { %v211_v8 = vsel %vm210_vm3, %v209_v7, %v178_v5 }
  0x94   : > { %v181_v9 = vpop.permute.xlu0 %180  ;;  %v184_v10 = vpop.permute.xlu1 %183 }
  0x95   : > { %v213_v11 = vsel %vm212_vm4, %v211_v8, %v181_v9 }
  0x96   : > { %v215_v12 = vsel %vm214_vm5, %v213_v11, %v184_v10 }
  0x98   : > { %v187_v13 = vpop.permute.xlu0 %186  ;;  %v190_v14 = vpop.permute.xlu1 %189 }
  0x99   : > { %v217_v15 = vsel %vm216_vm6, %v215_v12, %v187_v13 }
  0x9a   : > { %v219_v16 = vsel %vm218_vm7, %v217_v15, %v190_v14 }
  0x9c   : > { %v193_v17 = vpop.permute.xlu0 %192  ;;  %v196_v18 = vpop.permute.xlu1 %195 }
  0x9d   : > { %v221_v19 = vsel %vm220_vm8, %v219_v16, %v193_v17 }
  0x9e   : > { %v223_v20 = vsel %vm222_vm9, %v221_v19, %v196_v18 }
  0xa0   : > { %v199_v21 = vpop.permute.xlu0 %198  ;;  %v202_v23 = vpop.permute.xlu1 %201 }
  0xa1   : > { %v225_v24 = vsel %vm224_vm10, %v223_v20, %v199_v21  ;;  %vm352_vm10 = vcmask 318464  }
  0xa2   : > { %v670_v26 = vsel %vm226_vm11, %v225_v24, %v202_v23 }
  0xa3   : > { %v235_v27 = vmul.f32 %v433_v22, %v670_v26 }
  0xa5   : > { %v673_v28 = vadd.f32 %v434_v25, %v235_v27 }
  0xa7   : > { %v247_v29 = vand.u32 2139095040, %v673_v28  ;;  %v244_v33 = vand.u32 2147483647, %v673_v28  ;;  %vm246_vm3 = vcmp.lt.s32.totalorder %v673_v28, 0  ;;  %vm336_vm9 = vweird.f32 %v673_v28 }
  0xa9   : > { %v248_v30 = vshrl.u32 %v247_v29, 23  ;;  %v251_v36 = vand.u32 8388607, %v244_v33  ;;  %vm245_vm4 = vcmp.le.f32.partialorder %v244_v33, 0.7853982 }
  0xab   : > { %v435_v31 = vadd.s32 4294967169, %v248_v30  ;;  %v252_v55 = vor.u32 8388608, %v251_v36 }
  0xad   : > { %v254_v32 = vadd.s32 1, %v435_v31  ;;  %v292_v5 = vshll.u32 %v252_v55, 8 }
  0xaf   : > { %vm255_vm12 = vcmp.gt.s32.totalorder %v254_v32, 0 }
  0xb0   : > { %v256_v34 = vsel %vm255_vm12, %v254_v32, 0 }
  0xb1   : > { %v258_v35 = vand.u32 31, %v256_v34  ;;  %v257_v38 = vshrl.u32 %v256_v34, 5 }
  0xb3   : > { %v259_v37 = vsub.s32 32, %v258_v35  ;;  %v261_v40 = vshll.u32 %v584_v39, %v258_v35  ;;  %v264_v42 = vshll.u32 %v585_v41, %v258_v35  ;;  %v267_v46 = vshll.u32 %v586_v44, %v258_v35 }
  0xb4   : > { %v270_v49 = vshll.u32 %v587_v47, %v258_v35  ;;  %v273_v52 = vshll.u32 %v588_v50, %v258_v35  ;;  %vm276_vm13 = vcmp.lt.s32.totalorder %v257_v38, 1  ;;  %vm279_vm14 = vcmp.lt.s32.totalorder %v257_v38, 4 }
  0xb5   : > { %v262_v43 = vshrl.u32 %v585_v41, %v259_v37  ;;  %v265_v45 = vshrl.u32 %v586_v44, %v259_v37  ;;  %v268_v48 = vshrl.u32 %v587_v47, %v259_v37  ;;  %v271_v51 = vshrl.u32 %v588_v50, %v259_v37 }
  0xb6   : > { %v274_v54 = vshrl.u32 %v589_v53, %v259_v37  ;;  %v260_v0 = vshrl.u32 %v584_v39, %v259_v37  ;;  %vm278_vm15 = vcmp.lt.s32.totalorder %v257_v38, 3  ;;  %vm277_vm0 = vcmp.lt.s32.totalorder %v257_v38, 2 }
  0xb7   : > { %v263_v56 = vor.u32 %v262_v43, %v261_v40  ;;  %v266_v57 = vor.u32 %v265_v45, %v264_v42  ;;  %v269_v58 = vor.u32 %v268_v48, %v267_v46  ;;  %v272_v59 = vor.u32 %v271_v51, %v270_v49 }
  0xb8   : > { %v275_v60 = vor.u32 %v274_v54, %v273_v52  ;;  %v348_v50 = vlaneseq }
  0xb9   : > { %v281_v61 = vsel %vm279_vm14, %v269_v58, 2102212464  ;;  %v284_v62 = vsel %vm276_vm13, %v263_v56, %v266_v57  ;;  %v288_v63 = vsel %vm276_vm13, %v266_v57, %v269_v58  ;;  %v285_v1 = vsel %vm279_vm14, %v272_v59, 920167782 }
  0xba   : > { %v289_v2 = vsel %vm279_vm14, %v275_v60, 1326507024  ;;  %v286_v3 = vsel %vm278_vm15, %v269_v58, %v285_v1  ;;  %v280_v6 = vsel %vm276_vm13, %v260_v0, %v263_v56  ;;  %v282_v7 = vsel %vm278_vm15, %v266_v57, %v281_v61 }
  0xbb   : > { %v290_v4 = vsel %vm278_vm15, %v272_v59, %v289_v2  ;;  %v287_v8 = vsel %vm277_vm0, %v284_v62, %v286_v3  ;;  %v283_v14 = vsel %vm277_vm0, %v280_v6, %v282_v7  ;;  %v349_v53 = vand.u32 127, %v348_v50 }
  0xbc   : > { %v291_v9 = vsel %vm277_vm0, %v288_v63, %v290_v4  ;;  %v682_v12 = vmul.u32.u64.low %v292_v5, %v287_v8  ;;  %v683_v13 = vmul.u32.u64.high %v292_v5, %v287_v8, %v682_v12  ;;  %v299_v16 = vmul.u32 %v292_v5, %v283_v14 }
  0xbd   : > { %v679_v10 = vmul.u32.u64.low %v292_v5, %v291_v9  ;;  %v680_v11 = vmul.u32.u64.high %v292_v5, %v291_v9, %v679_v10  ;;  %vm350_vm7 = vcmp.lt.s32.totalorder %v349_v53, 3 }
  0xbe   : > { %v302_v15 = vadd.s32 1, %v683_v13 }
  0xbf   : > { %vm301_vm1 = vc.u32 %v680_v11, %v682_v12  ;;  %v300_v30 = vadd.s32 %v682_v12, %v680_v11 }
  0xc0   : > { %v303_v17 = vsel %vm301_vm1, %v302_v15, %v683_v13 }
  0xc1   : > { %v304_v18 = vadd.s32 %v303_v17, %v299_v16 }
  0xc3   : > { %v305_v19 = vadd.s32 536870912, %v304_v18 }
  0xc5   : > { %v306_v20 = vshrl.u32 %v305_v19, 30 }
  0xc7   : > { %v307_v21 = vshll.u32 %v306_v20, 30  ;;  %v330_v43 = vsub.s32 4, %v306_v20 }
  0xc9   : > { %v308_v22 = vsub.s32 %v304_v18, %v307_v21  ;;  %v331_v46 = vsel %vm246_vm3, %v330_v43, %v306_v20 }
  0xca   : > { %v333_v48 = vsel %vm245_vm4, 0, %v331_v46 }
  0xcb   : > { %v310_v23 = vsub.s32 0, %v308_v22  ;;  %v337_v49 = vadd.s32 3, %v333_v48 }
  0xcd   : > { %v436_v24 = vmin.u32 %v310_v23, %v308_v22  ;;  %v338_v51 = vand.u32 3, %v337_v49 }
  0xcf   : > { %v312_v25 = vclz %v436_v24  ;;  %vm343_vm5 = vcmp.eq.s32.totalorder %v338_v51, 2  ;;  %vm340_vm6 = vcmp.eq.s32.totalorder %v338_v51, 0  ;;  %vm339_vm8 = vcmp.lt.s32.totalorder %v338_v51, 2 }
  0xd1   : > { %v437_v27 = vadd.s32 4294967294, %v312_v25 }
  0xd3   : > { %vm438_vm2 = vcmp.lt.s32.totalorder %v437_v27, 0 }
  0xd4   : > { %v315_v29 = vsel %vm438_vm2, 0, %v437_v27 }
  0xd5   : > { %v316_v31 = vsub.s32 32, %v315_v29  ;;  %v320_v32 = vsub.s32 4294967266, %v315_v29  ;;  %v317_v34 = vshll.u32 %v308_v22, %v315_v29 }
  0xd7   : > { %v318_v35 = vshrl.u32 %v300_v30, %v316_v31  ;;  %v321_v36 = vadd.s32 127, %v320_v32 }
  0xd9   : > { %v319_v37 = vor.u32 %v318_v35, %v317_v34  ;;  %v322_v38 = vshll.u32 %v321_v36, 23 }
  0xdb   : > { %v323_v39 = vor.u32 4788187, %v322_v38  ;;  %v326_v41 = vcvt.s32.f32 %v319_v37 }
  0xdd   : > { %v324_v40 = vand.u32 2147483647, %v323_v39 }
  0xdf   : > { %v327_v42 = vmul.f32 %v326_v41, %v324_v40 }
  0xe1   : > { %v328_v44 = vxor.u32 2147483648, %v327_v42 }
  0xe3   : > { %v329_v45 = vsel %vm246_vm3, %v328_v44, %v327_v42 }
  0xe4   : > { %v332_v47 = vsel %vm245_vm4, %v673_v28, %v329_v45 }
  0xe5   : > { %504 = vcosq.f32 %v332_v47 }
  0xe6   : > { %506 = vsinq.f32 %v332_v47 }
  0xef   : > { %v505_v52 = vpop.eup %504 }
  0xf0   : > { %v507_v54 = vpop.eup %506  ;;  %v344_v55 = vxor.u32 2147483648, %v505_v52 }
  0xf1   : > { %v341_v56 = vxor.u32 2147483648, %v507_v54 }
  0xf2   : > { %v345_v33 = vsel %vm343_vm5, %v344_v55, %v507_v54 }
  0xf3   : > { %v342_v57 = vsel %vm340_vm6, %v505_v52, %v341_v56 }
  0xf4   : > { %v346_v58 = vsel %vm339_vm8, %v342_v57, %v345_v33 }
  0xf5   : > { %v347_v59 = vsel %vm336_vm9, nan, %v346_v58 }
  0xf6   : > { %v351_v60 = vsel %vm350_vm7, %v670_v26, %v347_v59 }
  0xf7   : > { %353 = vst.msk [vmem:[%s161_s30] sm:$0xff] %vm352_vm10, %v351_v60 }
  0xf8   : > { %521 = shalt.err (!%p518_p3)
}
  0xf9   : > { %s522_s17 = scalar_lea.hbm %s699_s7, 128  ;;  %s526_s24 = scalar_lea.hbm %s745_s3, 256 }
  0xfa   : > { %p523_p4 = scmp.ne.s32.totalorder %s699_s7, %s522_s17  ;;  %p527_p9 = scmp.lt.u32.totalorder %s699_s7, %s745_s3 }
  0xfb   : > { %p528_p10 = scmp.lt.u32.totalorder %s526_s24, %s522_s17  ;;  %p530_p12 = scmp.lt.u32.totalorder %s522_s17, %s699_s7 }
  0xfc   : > { %p524_p7 = pnand %p523_p4, %p649_p5 }
  0xfd   : > { %p529_p11 = por %p528_p10, %p527_p9 }
  0xfe   : > { %p525_p8 = pneg %p524_p7 }
  0xff   : > { %p531_p13 = por %p530_p12, %p529_p11 }
 0x101   : > { %p532_p0 = pnand %p531_p13, %p525_p8 }
 0x103   : > { %535 = shalt.err (!%p532_p0)
}
 0x104   : > { %447 = dma.vmem_to_hbm [thread:$0]  (%p649_p5), %s701_s4, 128, %s699_s7, %s355_s16  }
 0x105 PF: > { %p453_p1 = scmp.ge.s32.totalorder %s570_s15, 2  ;;  %s380_s27 = sand.u32 1, %s558_s12  }
 0x106   : > { %s381_s28 = scalar_lea.sflag [#allocation3], %s380_s27 }
 0x107   : > { %p450_p2 = pnand %p453_p1, %p653_p6 }
 0x109   : > { %553 = dma.done.wait (!%p450_p2), %s381_s28, 128  }
 0x10a   : > { %555 = vsyncadd (!%p450_p2), %s381_s28, 4294967168  ;;  %p13_p3 = scmp.ge.s32.totalorder %s636_s18, 4   ;;  %s748_s12 = smov %s562_s13 }
 0x10b   : > { %s749_s13 = smov %s566_s14  ;;  %s750_s14 = smov %s647_s21 }
 0x10c   : > { %s751_s15 = smov %s636_s18  ;;  %15 = sbr.rel (!%p13_p3) target bundleno = 3 (0x3), region = 67 }
 0x113   :  { %386 = vsyncpa [#allocation3], 1 }
 0x114   :  { %388 = vsyncpa [#allocation3 + $0x1], 1 }

</bundles_post_ra>
